<compile_context>
chip_gen: v5e
topology: v5e:2x2
jax: 0.10.0
libtpu: 0.0.40
codegen_flags: <defaults>
</compile_context>

<pallas_src>
import jax
import jax.numpy as jnp
from jax import lax
from jax.experimental import pallas as pl
from jax.experimental.pallas import tpu as pltpu

# ----- hyperparams (synthetic "args") -----------------------------------------
N_AGENTS    = 4
STATE_DIMS  = 24
Z_DIMS      = 32
Z2          = 2 * Z_DIMS
VAR_FLOOR   = 1e-2
STD_FLOOR   = float(VAR_FLOOR ** 0.5)      # compile-time constant
BN_EPS      = 1e-5
LEAKY_SLOPE = 0.01

# single param-slab row layout (all offsets multiples of 8 -> sublane-aligned views)
_W1_LO, _W1_HI = 0, STATE_DIMS                      # fc1, padded to 2Z cols (cols Z:2Z zero)
_WA_LO, _WA_HI = _W1_HI, _W1_HI + Z2                # [Wm1 | Ws1], rows Z:2Z zero
_WB_LO, _WB_HI = _WA_HI, _WA_HI + Z2                # blockdiag(Wm2, Ws2)
_V_LO,  _V_HI  = _WB_HI, _WB_HI + 8                 # b1 | ba | gamma | beta | bb | pad x3
P_SLAB_ROWS    = _V_HI                              # 160


# ----- the fused kernel --------------------------------------------------------
def hlp2_kernel(state_ref, p_ref, out_ref):
    x = state_ref[...]                                            # (B, STATE_DIMS)

    w1 = p_ref[_W1_LO:_W1_HI, :]                                  # (S, 2Z)
    wa = p_ref[_WA_LO:_WA_HI, :]                                  # (2Z, 2Z)
    wb = p_ref[_WB_LO:_WB_HI, :]                                  # (2Z, 2Z)
    v  = p_ref[_V_LO:_V_HI, :]                                    # (8, 2Z)
    b1    = v[0:1, :]
    ba    = v[1:2, :]
    gamma = v[2:3, :]
    beta  = v[3:4, :]
    bb    = v[4:5, :]

    # fc1 (right half of z is exactly zero by construction of the padded slab)
    z = jnp.dot(x, w1, preferred_element_type=jnp.float32) + b1   # (B, 2Z)

    # fused first branch layer: [mu-branch | sigma-branch]
    h = jnp.dot(z, wa, preferred_element_type=jnp.float32) + ba   # (B, 2Z)

    # BatchNorm1d (training mode): per-feature batch mean & biased variance.
    inv_b = 1.0 / h.shape[0]                                      # compile-time constant
    mean = jnp.sum(h, axis=0, keepdims=True) * inv_b
    ctr  = h - mean
    var  = jnp.sum(ctr * ctr, axis=0, keepdims=True) * inv_b
    scale = gamma * lax.rsqrt(var + BN_EPS)                       # gamma folded into scale
    hn   = ctr * scale + beta
    act  = jnp.where(hn >= 0, hn, LEAKY_SLOPE * hn)               # LeakyReLU(0.01)

    # fused second branch layer (block-diagonal): y = [mu | sigma]
    y = jnp.dot(act, wb, preferred_element_type=jnp.float32) + bb  # (B, 2Z)

    # sigma half -> std = max(exp(0.5*sigma), sqrt(var_floor)); mu half passes through.
    # Lane mask instead of slice/concat to avoid any cross-lane data movement.
    col = lax.broadcasted_iota(jnp.int32, y.shape, 1)
    std_all = jnp.maximum(jnp.exp(0.5 * y), STD_FLOOR)
    out_ref[...] = jnp.where(col >= Z_DIMS, std_all, y)


# ----- wrapper ------------------------------------------------------------------
def high_level_policy2_forward(state_seq, obs, t, pslab):
    """state_seq: (b, T, state_dims); obs: (b, a, e). Returns (mu, std), each (b*a, z_dims)."""
    b, a, _ = obs.shape
    state = state_seq[:, t, :]                                    # (b, state_dims) — no repeat!

    vmem = pl.BlockSpec(memory_space=pltpu.MemorySpace.VMEM)
    out = pl.pallas_call(
        hlp2_kernel,
        out_shape=jax.ShapeDtypeStruct((b, Z2), jnp.float32),
        in_specs=[vmem, vmem],
        out_specs=vmem,
    )(state, pslab)                                               # (b, 2Z): [mu | std]

    # Broadcast to the per-agent layout of the original module: rows [b0 x a, b1 x a, ...]
    out_full = jnp.broadcast_to(out[:, None, :], (b, a, Z2)).reshape(b * a, Z2)
    mu = out_full[:, :Z_DIMS]
    std = out_full[:, Z_DIMS:]
    return mu, std


# ----- host-side one-time parameter packing --------------------------------------
def pack_params(p):
    S, Z = STATE_DIMS, Z_DIMS
    w1p = jnp.zeros((S, Z2), jnp.float32).at[:, :Z].set(p["w1"])
    wa = (jnp.zeros((Z2, Z2), jnp.float32)
          .at[:Z, :Z].set(p["wm1"])
          .at[:Z, Z:].set(p["ws1"]))
    wb = (jnp.zeros((Z2, Z2), jnp.float32)
          .at[:Z, :Z].set(p["wm2"])
          .at[Z:, Z:].set(p["ws2"]))

    b1p   = jnp.zeros((1, Z2), jnp.float32).at[:, :Z].set(p["b1"])
    ba    = jnp.concatenate([p["bm1"], p["bs1"]], axis=1)
    gamma = jnp.concatenate([p["gm"], p["gs"]], axis=1)
    beta  = jnp.concatenate([p["betam"], p["betas"]], axis=1)
    bb    = jnp.concatenate([p["bm2"], p["bs2"]], axis=1)
    vblk  = jnp.concatenate(
        [b1p, ba, gamma, beta, bb,
         jnp.zeros((_V_HI - _V_LO - 5, Z2), jnp.float32)], axis=0)      # (8, 64)

    pslab = jnp.concatenate([w1p, wa, wb, vblk], axis=0)                # (160, 64)
    assert pslab.shape == (P_SLAB_ROWS, Z2)
    return pslab


# ----- deterministic parameter init --------------------------------------------
def init_params(key):
    ks = jax.random.split(key, 12)

    def lin(k, fan_in, fan_out):
        kw, kb = jax.random.split(k)
        bound = 1.0 / jnp.sqrt(fan_in)
        w = jax.random.uniform(kw, (fan_in, fan_out), jnp.float32, -bound, bound)  # (in, out)
        b = jax.random.uniform(kb, (1, fan_out), jnp.float32, -bound, bound)
        return w, b

    p = {}
    p["w1"],  p["b1"]  = lin(ks[0], STATE_DIMS, Z_DIMS)
    p["wm1"], p["bm1"] = lin(ks[1], Z_DIMS, Z_DIMS)
    p["wm2"], p["bm2"] = lin(ks[2], Z_DIMS, Z_DIMS)
    p["ws1"], p["bs1"] = lin(ks[3], Z_DIMS, Z_DIMS)
    p["ws2"], p["bs2"] = lin(ks[4], Z_DIMS, Z_DIMS)
    p["gm"]    = jnp.ones((1, Z_DIMS), jnp.float32)
    p["betam"] = jnp.zeros((1, Z_DIMS), jnp.float32)
    p["gs"]    = jnp.ones((1, Z_DIMS), jnp.float32)
    p["betas"] = jnp.zeros((1, Z_DIMS), jnp.float32)
    return p


# ----- pure-JAX reference (faithful to the PyTorch module, with the agent repeat) -----
def reference_forward(state_seq, obs, t, p):
    b, a, _ = obs.shape
    state = state_seq[:, t, :]
    x = jnp.repeat(state[:, None, :], a, axis=1).reshape(b * a, -1)
    z = x @ p["w1"] + p["b1"]

    def branch(w1, b1, g, beta, w2, b2):
        h = z @ w1 + b1
        m = h.mean(0, keepdims=True)
        v = ((h - m) ** 2).mean(0, keepdims=True)
        hn = (h - m) / jnp.sqrt(v + BN_EPS) * g + beta
        act = jnp.where(hn >= 0, hn, LEAKY_SLOPE * hn)
        return act @ w2 + b2

    mu = branch(p["wm1"], p["bm1"], p["gm"], p["betam"], p["wm2"], p["bm2"])
    sg = branch(p["ws1"], p["bs1"], p["gs"], p["betas"], p["ws2"], p["bs2"])
    var = jnp.maximum(jnp.exp(sg), VAR_FLOOR)
    return mu, jnp.sqrt(var)


if __name__ == "__main__":
    key = jax.random.PRNGKey(0)
    k_state, k_obs, k_params = jax.random.split(key, 3)

    b, T = 2, 5
    obs_dim = 16
    t = 3

    state_seq = jax.random.normal(k_state, (b, T, STATE_DIMS), jnp.float32)
    obs = jax.random.normal(k_obs, (b, N_AGENTS, obs_dim), jnp.float32)
    params = init_params(k_params)
    pslab = pack_params(params)      # one-time host-side packing (single (160, 64) slab)

    mu, std = high_level_policy2_forward(state_seq, obs, t, pslab)
    jax.block_until_ready((mu, std))

    mu_ref, std_ref = reference_forward(state_seq, obs, t, params)
    assert mu.shape == (b * N_AGENTS, Z_DIMS) and std.shape == (b * N_AGENTS, Z_DIMS)
    assert jnp.allclose(mu, mu_ref, atol=1e-4, rtol=1e-4)
    assert jnp.allclose(std, std_ref, atol=1e-4, rtol=1e-4)

    print("KERNEL_OK")
</pallas_src>

<mosaic_0001>
module attributes {stable_mosaic.version = 11 : i64} {
  func.func @hlp2_kernel(%arg0: memref<2x24xf32, #tpu.memory_space<vmem>>, %arg1: memref<160x64xf32, #tpu.memory_space<vmem>>, %arg2: memref<2x64xf32, #tpu.memory_space<vmem>>) attributes {dimension_semantics = [], scalar_prefetch = 0 : i64, scratch_operands = 0 : i64, tpu.core_type = #tpu.core_type<tc>} {
    %c0 = arith.constant 0 : index
    %c0_0 = arith.constant 0 : index
    %0 = vector.load %arg0[%c0, %c0_0] : memref<2x24xf32, #tpu.memory_space<vmem>>, vector<2x24xf32>
    %c0_1 = arith.constant 0 : index
    %c0_2 = arith.constant 0 : index
    %1 = vector.load %arg1[%c0_1, %c0_2] : memref<160x64xf32, #tpu.memory_space<vmem>>, vector<24x64xf32>
    %c24 = arith.constant 24 : index
    %c0_3 = arith.constant 0 : index
    %2 = vector.load %arg1[%c24, %c0_3] : memref<160x64xf32, #tpu.memory_space<vmem>>, vector<64x64xf32>
    %c88 = arith.constant 88 : index
    %c0_4 = arith.constant 0 : index
    %3 = vector.load %arg1[%c88, %c0_4] : memref<160x64xf32, #tpu.memory_space<vmem>>, vector<64x64xf32>
    %c152 = arith.constant 152 : index
    %c0_5 = arith.constant 0 : index
    %4 = vector.load %arg1[%c152, %c0_5] : memref<160x64xf32, #tpu.memory_space<vmem>>, vector<8x64xf32>
    %5 = vector.extract_strided_slice %4 {offsets = [0, 0], sizes = [1, 64], strides = [1, 1]} : vector<8x64xf32> to vector<1x64xf32>
    %6 = vector.extract_strided_slice %4 {offsets = [1, 0], sizes = [1, 64], strides = [1, 1]} : vector<8x64xf32> to vector<1x64xf32>
    %7 = vector.extract_strided_slice %4 {offsets = [2, 0], sizes = [1, 64], strides = [1, 1]} : vector<8x64xf32> to vector<1x64xf32>
    %8 = vector.extract_strided_slice %4 {offsets = [3, 0], sizes = [1, 64], strides = [1, 1]} : vector<8x64xf32> to vector<1x64xf32>
    %9 = vector.extract_strided_slice %4 {offsets = [4, 0], sizes = [1, 64], strides = [1, 1]} : vector<8x64xf32> to vector<1x64xf32>
    %cst = arith.constant dense<0.000000e+00> : vector<2x64xf32>
    %10 = tpu.matmul %0, %1, %cst {dimension_numbers = #tpu.dot_dimension_numbers<[1], [0], [0], [1], [0, 0, 1, 1], [], []>} : vector<2x24xf32>, vector<24x64xf32>, vector<2x64xf32> -> vector<2x64xf32>
    %11 = vector.broadcast %5 : vector<1x64xf32> to vector<2x64xf32>
    %12 = arith.addf %10, %11 : vector<2x64xf32>
    %cst_6 = arith.constant dense<0.000000e+00> : vector<2x64xf32>
    %13 = tpu.matmul %12, %2, %cst_6 {dimension_numbers = #tpu.dot_dimension_numbers<[1], [0], [0], [1], [0, 0, 1, 1], [], []>} : vector<2x64xf32>, vector<64x64xf32>, vector<2x64xf32> -> vector<2x64xf32>
    %14 = vector.broadcast %6 : vector<1x64xf32> to vector<2x64xf32>
    %15 = arith.addf %13, %14 : vector<2x64xf32>
    %cst_7 = arith.constant dense<0.000000e+00> : vector<64xf32>
    %16 = vector.multi_reduction <add>, %15, %cst_7 [0] : vector<2x64xf32> to vector<64xf32>
    %17 = vector.shape_cast %16 : vector<64xf32> to vector<1x64xf32>
    %cst_8 = arith.constant 5.000000e-01 : f32
    %18 = vector.broadcast %cst_8 : f32 to vector<1x64xf32>
    %19 = arith.mulf %17, %18 : vector<1x64xf32>
    %20 = vector.broadcast %19 : vector<1x64xf32> to vector<2x64xf32>
    %21 = arith.subf %15, %20 : vector<2x64xf32>
    %22 = arith.mulf %21, %21 : vector<2x64xf32>
    %cst_9 = arith.constant dense<0.000000e+00> : vector<64xf32>
    %23 = vector.multi_reduction <add>, %22, %cst_9 [0] : vector<2x64xf32> to vector<64xf32>
    %24 = vector.shape_cast %23 : vector<64xf32> to vector<1x64xf32>
    %cst_10 = arith.constant 5.000000e-01 : f32
    %25 = vector.broadcast %cst_10 : f32 to vector<1x64xf32>
    %26 = arith.mulf %24, %25 : vector<1x64xf32>
    %cst_11 = arith.constant 9.99999974E-6 : f32
    %27 = vector.broadcast %cst_11 : f32 to vector<1x64xf32>
    %28 = arith.addf %26, %27 : vector<1x64xf32>
    %29 = math.rsqrt %28 : vector<1x64xf32>
    %30 = arith.mulf %7, %29 : vector<1x64xf32>
    %31 = vector.broadcast %30 : vector<1x64xf32> to vector<2x64xf32>
    %32 = arith.mulf %21, %31 : vector<2x64xf32>
    %33 = vector.broadcast %8 : vector<1x64xf32> to vector<2x64xf32>
    %34 = arith.addf %32, %33 : vector<2x64xf32>
    %cst_12 = arith.constant 0.000000e+00 : f32
    %35 = vector.broadcast %cst_12 : f32 to vector<2x64xf32>
    %36 = arith.cmpf oge, %34, %35 : vector<2x64xf32>
    %cst_13 = arith.constant 0.00999999977 : f32
    %37 = vector.broadcast %cst_13 : f32 to vector<2x64xf32>
    %38 = arith.mulf %37, %34 : vector<2x64xf32>
    %39 = arith.select %36, %34, %38 : vector<2x64xi1>, vector<2x64xf32>
    %cst_14 = arith.constant dense<0.000000e+00> : vector<2x64xf32>
    %40 = tpu.matmul %39, %3, %cst_14 {dimension_numbers = #tpu.dot_dimension_numbers<[1], [0], [0], [1], [0, 0, 1, 1], [], []>} : vector<2x64xf32>, vector<64x64xf32>, vector<2x64xf32> -> vector<2x64xf32>
    %41 = vector.broadcast %9 : vector<1x64xf32> to vector<2x64xf32>
    %42 = arith.addf %40, %41 : vector<2x64xf32>
    %43 = tpu.iota {dimensions = array<i32: 1>} : vector<2x64xi32>
    %cst_15 = arith.constant 5.000000e-01 : f32
    %44 = vector.broadcast %cst_15 : f32 to vector<2x64xf32>
    %45 = arith.mulf %44, %42 : vector<2x64xf32>
    %46 = math.exp %45 : vector<2x64xf32>
    %cst_16 = arith.constant 1.000000e-01 : f32
    %47 = vector.broadcast %cst_16 : f32 to vector<2x64xf32>
    %48 = arith.maximumf %46, %47 : vector<2x64xf32>
    %c32_i32 = arith.constant 32 : i32
    %49 = vector.broadcast %c32_i32 : i32 to vector<2x64xi32>
    %50 = arith.cmpi sge, %43, %49 : vector<2x64xi32>
    %51 = arith.select %50, %48, %42 : vector<2x64xi1>, vector<2x64xf32>
    %c0_17 = arith.constant 0 : index
    %c0_18 = arith.constant 0 : index
    %52 = vector.load %arg2[%c0_17, %c0_18] : memref<2x64xf32, #tpu.memory_space<vmem>>, vector<2x64xf32>
    tpu.vector_store %arg2[%c0_17, %c0_18], %51 {strides = array<i32>} : memref<2x64xf32, #tpu.memory_space<vmem>>, vector<2x64xf32>,
    return
  }
}

</mosaic_0001>

<bundles_post_ra>
// kernel: tpu_custom_call.1
= control target key start
LH: loop header
LB: loop body
LE: loop exit
PB: predicated region body
PF: predicated region fallthrough
CT: control target
= control target key end

     0   :  { %vm34_vm0 = vcmask 195584   ;;  %s298_s0 = inlined_call_operand.vmem [shape: f32[2,24], index: 0, kind: input, shape index: {}]   ;;  %s299_s1 = inlined_call_operand.vmem [shape: f32[160,64], index: 1, kind: input, shape index: {}]   ;;  %s300_s2 = inlined_call_operand.hbm [shape: f32[2,64], index: 2, kind: output, shape index: {}]  }
   0x1   :  { %v15_v0 = vld [vmem:[%s299_s1 + $0x10] sm:$0xff]  ;;  %v14_v1 = vld [vmem:[%s299_s1 + $0x8] sm:$0xff]  ;;  %v13_v4 = vld [vmem:[%s299_s1] sm:$0xff] }
   0x2   :  { %51 = vmatpush.msra.mxu0 %v15_v0  ;;  %v23_v2 = vld [vmem:[%s299_s1 + $0x50] sm:$0xff]  ;;  %v22_v3 = vld [vmem:[%s299_s1 + $0x48] sm:$0xff]  ;;  %v12_v5 = vld [vmem:[%s298_s0] sm:$0x3] }
   0x3   :  { %71 = vmatpush.msra.mxu1 %v23_v2  ;;  %v21_v6 = vld [vmem:[%s299_s1 + $0x40] sm:$0xff] }
   0x4   :  { %52 = vmatpush.msra.mxu0 %v14_v1 }
   0x5   :  { %7 = vsyncpa [#allocation3], 0  ;;  %72 = vmatpush.msra.mxu1 %v22_v3  ;;  %v20_v7 = vld [vmem:[%s299_s1 + $0x38] sm:$0xff]  ;;  %v19_v8 = vld [vmem:[%s299_s1 + $0x30] sm:$0xff]  ;;  %vm59_vm1 = vcmask 523264   ;;  %vm83_vm2 = vcmask 517120   ;;  %v145_v1 = vlaneseq }
   0x6   :  { %53 = vmatpush.msra.mxu0 %v13_v4  ;;  %v18_v9 = vld [vmem:[%s299_s1 + $0x28] sm:$0xff]  ;;  %v17_v10 = vld [vmem:[%s299_s1 + $0x20] sm:$0xff]  ;;  %v16_v11 = vld [vmem:[%s299_s1 + $0x18] sm:$0xff]  ;;  %s161_s25 = sshll.u32 %s300_s2, 4  ;;  %s162_s25 = int_to_ptr.hbm [resolvable:$true] %s161_s25 }
   0x7   :  { %170 = vmatmul.msk.f32.vlgmr.msra.gmra.mxu0 %vm34_vm0, %v12_v5  ;;  %73 = vmatpush.msra.mxu1 %v21_v6  ;;  %v259_v12 = vld [vmem:[%s299_s1 + $0x98] sm:$0xff]  ;;  %v31_v29 = vld [vmem:[%s299_s1 + $0x90] sm:$0xff]  ;;  %v30_v31 = vld [vmem:[%s299_s1 + $0x88] sm:$0xff]  ;;  %v146_v2 = vand.u32 127, %v145_v1 }
   0x8   :  { %v33_v13 = vperm.slane %v259_v12, 0  ;;  %v58_v16 = vperm.slane %v259_v12, 1  ;;  %133 = vmatpush.msra.mxu2 %v31_v29  ;;  %v29_v33 = vld [vmem:[%s299_s1 + $0x80] sm:$0xff]  ;;  %v28_v35 = vld [vmem:[%s299_s1 + $0x78] sm:$0xff]  ;;  %v27_v37 = vld [vmem:[%s299_s1 + $0x70] sm:$0xff]  ;;  %v116_v55 = vperm.slane %v259_v12, 3 }
   0x9   :  { %74 = vmatpush.msra.mxu1 %v20_v7  ;;  %v26_v39 = vld [vmem:[%s299_s1 + $0x68] sm:$0xff]  ;;  %v25_v40 = vld [vmem:[%s299_s1 + $0x60] sm:$0xff]  ;;  %v24_v42 = vld [vmem:[%s299_s1 + $0x58] sm:$0xff]  ;;  %v121_v60 = vperm.slane %v259_v12, 4  ;;  %s204_s1 = smov [#allocation2]   ;;  %vm151_vm7 = vcmp.ge.s32.totalorder %v146_v2, 32 }
   0xa   :  { %134 = vmatpush.msra.mxu2 %v30_v31  ;;  %s159_s22 = sshll.u32 %s204_s1, 4  ;;  %s160_s22 = int_to_ptr.vmem [resolvable:$true] %s159_s22 }
   0xb   :  { %75 = vmatpush.msra.mxu1 %v19_v8 }
   0xc   :  { %135 = vmatpush.msra.mxu2 %v29_v33 }
   0xd   :  { %76 = vmatpush.msra.mxu1 %v18_v9 }
   0xe   :  { %136 = vmatpush.msra.mxu2 %v28_v35 }
   0xf   :  { %77 = vmatpush.msra.mxu1 %v17_v10 }
  0x10   :  { %137 = vmatpush.msra.mxu2 %v27_v37 }
  0x11   :  { %78 = vmatpush.msra.mxu1 %v16_v11 }
  0x12   :  { %138 = vmatpush.msra.mxu2 %v26_v39 }
  0x14   :  { %139 = vmatpush.msra.mxu2 %v25_v40 }
  0x16   :  { %140 = vmatpush.msra.mxu2 %v24_v42 }
  0x84   :  { %v55_v14 = vpop.f32.mrf.mxu0 }
  0x85   :  { %v56_v15 = vadd.f32 %v55_v14, %v33_v13 }
  0x87   :  { %171 = vmatmul.msk.f32.vlgmr.msra.gmra.mxu1 %vm59_vm1, %v56_v15 }
 0x104   :  { %v80_v17 = vpop.f32.mrf.mxu1 }
 0x105   :  { %v81_v18 = vadd.f32 %v80_v17, %v58_v16 }
 0x107   :  { %v84_v19 = vsel %vm83_vm2, %v81_v18, 0.0 }
 0x108   :  { %v85_v20 = vrot.slane %v84_v19, 4 }
 0x10a   :  { %v86_v21 = vadd.f32 %v85_v20, %v84_v19 }
 0x10c   :  { %v87_v22 = vrot.slane %v86_v21, 2 }
 0x10e   :  { %v88_v23 = vadd.f32 %v87_v22, %v86_v21 }
 0x110   :  { %v89_v24 = vrot.slane %v88_v23, 1 }
 0x112   :  { %v90_v25 = vadd.f32 %v89_v24, %v88_v23 }
 0x114   :  { %v91_v26 = vmul.f32 0.5, %v90_v25 }
 0x116   :  { %v92_v27 = vsub.f32 %v81_v18, %v91_v26 }
 0x118   :  { %v93_v28 = vmul.f32 %v92_v27, %v92_v27 }
 0x11a   :  { %v94_v30 = vsel %vm83_vm2, %v93_v28, 0.0 }
 0x11b   :  { %v95_v32 = vrot.slane %v94_v30, 4 }
 0x11d   :  { %v96_v34 = vadd.f32 %v95_v32, %v94_v30 }
 0x11f   :  { %v97_v36 = vrot.slane %v96_v34, 2 }
 0x121   :  { %v98_v38 = vadd.f32 %v97_v36, %v96_v34 }
 0x123   :  { %v99_v41 = vrot.slane %v98_v38, 1 }
 0x125   :  { %v100_v43 = vadd.f32 %v99_v41, %v98_v38 }
 0x127   :  { %v101_v44 = vmul.f32 0.5, %v100_v43 }
 0x129   :  { %v102_v45 = vadd.f32 1e-05, %v101_v44 }
 0x12b   :  { %174 = vrsqrt.f32 %v102_v45  ;;  %vm109_vm4 = vweird.f32 %v102_v45 }
 0x131   :  { %v175_v46 = vpop.eup %174 }
 0x132   :  { %v104_v47 = vmul.f32 %v175_v46, %v102_v45  ;;  %vm110_vm3 = vweird.f32 %v175_v46 }
 0x133   :  { %vm111_vm5 = vmor %vm109_vm4, %vm110_vm3 }
 0x134   :  { %v105_v48 = vmul.f32 %v175_v46, %v104_v47 }
 0x136   :  { %v106_v49 = vmul.f32 0.5, %v105_v48 }
 0x138   :  { %v107_v50 = vsub.f32 1.5, %v106_v49 }
 0x13a   :  { %v108_v51 = vmul.f32 %v175_v46, %v107_v50 }
 0x13c   :  { %v112_v52 = vsel %vm111_vm5, %v175_v46, %v108_v51 }
 0x13d   :  { %v113_v53 = vmul.f32 %v112_v52, %v259_v12 }
 0x13f   :  { %v114_v54 = vperm.slane %v113_v53, 2 }
 0x141   :  { %v115_v56 = vmul.f32 %v114_v54, %v92_v27 }
 0x143   :  { %v117_v57 = vadd.f32 %v116_v55, %v115_v56 }
 0x145   :  { %vm118_vm6 = vcmp.ge.f32.partialorder %v117_v57, 0.0  ;;  %v119_v58 = vmul.f32 0.01, %v117_v57 }
 0x147   :  { %v120_v59 = vsel %vm118_vm6, %v117_v57, %v119_v58 }
 0x148   :  { %172 = vmatmul.msk.f32.vlgmr.msra.gmra.mxu2 %vm59_vm1, %v120_v59 }
 0x1cb   :  { %v142_v61 = vpop.f32.mrf.mxu2 }
 0x1cc   :  { %v143_v62 = vadd.f32 %v142_v61, %v121_v60 }
 0x1ce   :  { %v147_v63 = vmul.f32 0.5, %v143_v62 }
 0x1d0   :  { %v148_v0 = vmul.f32 1.442695, %v147_v63 }
 0x1d2   :  { %176 = vpow2.f32 %v148_v0 }
 0x1d8   :  { %v177_v3 = vpop.eup %176 }
 0x1d9   :  { %v150_v4 = vmax.f32 %v177_v3, 0.1 }
 0x1db   :  { %v152_v5 = vsel %vm151_vm7, %v150_v4, %v143_v62 }
 0x1dc   :  { %153 = vst.msk [vmem:[#allocation2] sm:$0x3] %vm83_vm2, %v152_v5 }
 0x1dd   :  { %164 = dma.vmem_to_hbm [thread:$0]  %s160_s22, 32, %s162_s25, [#allocation3]  }
 0x1de   :  { %202 = dma.done.wait [#allocation3], 32  }
 0x1df   :  { %203 = vsyncadd [#allocation3], 4294967264 }
 0x1e0   :  { %169 = vsyncpa [#allocation3], 1 }

</bundles_post_ra>
